<compile_context>
chip_gen: v7x
topology: tpu7x:2x2x1
jax: 0.10.0
libtpu: 0.0.40
codegen_flags: <defaults>
</compile_context>

<pallas_src>
import math

import jax
import jax.numpy as jnp
from jax.experimental import pallas as pl
from jax.experimental.pallas import tpu as pltpu


def attn_kernel(u_ref, v_ref, wu_ref, wv_ref, bvp_ref, wd_ref, attn_ref):
    # Upcast in-register (inputs may stream in as bf16).
    u = u_ref[...].astype(jnp.float32)       # [Bb, T, H]
    vb = v_ref[...].astype(jnp.float32)      # [Bb, H]
    wu_vp = wu_ref[...]                      # [1, H]  (= W_u^T @ v_param)
    wv_vp = wv_ref[...]                      # [1, H]  (= W_v^T @ v_param)
    b_vp = bvp_ref[...]                      # [1, 1]  (= bias . v_param)

    # score[b, t] = u[b, t] . wu_vp + v[b] . wv_vp + bias . v_param
    score_u = jnp.sum(u * wu_vp[None, :, :], axis=-1)             # [Bb, T]
    score_v = jnp.sum(vb * wv_vp, axis=-1, keepdims=True)         # [Bb, 1]
    score = score_u + score_v + b_vp                              # [Bb, T]

    # Softmax over the sequence dimension (independent per batch row).
    m = jnp.max(score, axis=-1, keepdims=True)
    ex = jnp.exp(score - m)
    attn = ex / jnp.sum(ex, axis=-1, keepdims=True)               # [Bb, T]

    # d = ||u - v||_2 over hidden, expanded form (no [Bb, T, H] diff temp).
    s_uu = jnp.sum(u * u, axis=-1)                                # [Bb, T]
    s_uv = jnp.sum(u * vb[:, None, :], axis=-1)                   # [Bb, T]
    s_vv = jnp.sum(vb * vb, axis=-1, keepdims=True)               # [Bb, 1]
    d = jnp.sqrt(jnp.maximum(s_uu - 2.0 * s_uv + s_vv, 0.0))      # [Bb, T]

    w_d = jnp.sum(d * attn, axis=-1)                              # [Bb]

    attn_ref[...] = attn.astype(attn_ref.dtype)                   # [Bb, T]
    wd_ref[...] = w_d[None, :].astype(wd_ref.dtype)               # lane-dense [1, Bb]


def attn_forward(u, v, W, bias, v_param):
    """u: [B,T,H], v: [B,H], W: [H,2H], bias: [H], v_param: [H]."""
    B, T, H = u.shape

    # ---- one-time parameter glue (tiny [H,H] x [H] matvecs on params) ----
    Wf = W.astype(jnp.float32)
    vp = v_param.astype(jnp.float32)
    wu_vp = (Wf[:, :H].T @ vp).reshape(1, H)                  # [1, H]
    wv_vp = (Wf[:, H:].T @ vp).reshape(1, H)                  # [1, H]
    b_vp = jnp.dot(bias.astype(jnp.float32), vp).reshape(1, 1)

    # ---- batch tile: whole batch if small, else a multiple of 128 sized so
    #      the double-buffered u block stays comfortably inside the scoped
    #      VMEM default on every chip (v5e: 16 MiB).
    row_bytes = T * H * u.dtype.itemsize
    budget = 4 * 1024 * 1024                                  # per-buffer target
    if B * row_bytes <= budget or B <= 128:
        Bb = B
    else:
        Bb = max(128, (budget // row_bytes) // 128 * 128)
    grid = (pl.cdiv(B, Bb),)

    vmem = pltpu.MemorySpace.VMEM
    wd, attn = pl.pallas_call(
        attn_kernel,
        out_shape=(
            jax.ShapeDtypeStruct((1, B), jnp.float32),        # w_d (lane-dense)
            jax.ShapeDtypeStruct((B, T), jnp.float32),        # attn
        ),
        grid=grid,
        in_specs=[
            pl.BlockSpec((Bb, T, H), lambda i: (i, 0, 0), memory_space=vmem),
            pl.BlockSpec((Bb, H), lambda i: (i, 0), memory_space=vmem),
            pl.BlockSpec((1, H), lambda i: (0, 0), memory_space=vmem),
            pl.BlockSpec((1, H), lambda i: (0, 0), memory_space=vmem),
            pl.BlockSpec((1, 1), lambda i: (0, 0), memory_space=vmem),
        ],
        out_specs=(
            pl.BlockSpec((1, Bb), lambda i: (0, i), memory_space=vmem),
            pl.BlockSpec((Bb, T), lambda i: (i, 0), memory_space=vmem),
        ),
        compiler_params=pltpu.CompilerParams(
            dimension_semantics=("parallel",),
        ),
    )(u, v, wu_vp, wv_vp, b_vp)
    return wd[0], attn


def ref_forward(u, v, W, bias, v_param):
    """Pure-JAX reference mirroring the PyTorch forward."""
    Hmat = jnp.broadcast_to(v[:, None, :], u.shape)
    cat = jnp.concatenate([u, Hmat], axis=-1)
    energy = cat @ W.T + bias
    score = energy @ v_param
    attn = jax.nn.softmax(score, axis=-1)
    d = jnp.sqrt(jnp.sum((u - Hmat) ** 2, axis=-1))
    w_d = jnp.sum(d * attn, axis=-1)
    return w_d, attn


if __name__ == "__main__":
    B, T, H = 2, 8, 32

    key = jax.random.PRNGKey(0)
    k_u, k_v, k_W, k_b, k_vp = jax.random.split(key, 5)

    u = jax.random.normal(k_u, (B, T, H), dtype=jnp.float32)
    v = jax.random.normal(k_v, (B, H), dtype=jnp.float32)

    # Deterministic param init matching nn.Linear / the module's uniform init.
    lin_bound = 1.0 / math.sqrt(2 * H)
    W = jax.random.uniform(k_W, (H, 2 * H), minval=-lin_bound, maxval=lin_bound,
                           dtype=jnp.float32)
    bias = jax.random.uniform(k_b, (H,), minval=-lin_bound, maxval=lin_bound,
                              dtype=jnp.float32)
    vp_bound = 1.0 / math.sqrt(H)
    v_param = jax.random.uniform(k_vp, (H,), minval=-vp_bound, maxval=vp_bound,
                                 dtype=jnp.float32)

    w_d, attn = attn_forward(u, v, W, bias, v_param)
    jax.block_until_ready((w_d, attn))

    w_d_ref, attn_ref = ref_forward(u, v, W, bias, v_param)
    assert w_d.shape == (B,) and attn.shape == (B, T)
    assert jnp.allclose(w_d, w_d_ref, rtol=1e-4, atol=1e-5)
    assert jnp.allclose(attn, attn_ref, rtol=1e-4, atol=1e-5)

    print("KERNEL_OK")
</pallas_src>

<mosaic_0001>
module attributes {stable_mosaic.version = 11 : i64} {
  func.func @attn_kernel(%arg0: i32, %arg1: memref<2x8x32xf32, #tpu.memory_space<vmem>>, %arg2: memref<2x32xf32, #tpu.memory_space<vmem>>, %arg3: memref<1x32xf32, #tpu.memory_space<vmem>>, %arg4: memref<1x32xf32, #tpu.memory_space<vmem>>, %arg5: memref<1x1xf32, #tpu.memory_space<vmem>>, %arg6: memref<1x2xf32, #tpu.memory_space<vmem>>, %arg7: memref<2x8xf32, #tpu.memory_space<vmem>>) attributes {dimension_semantics = [#tpu.dimension_semantics<parallel>], iteration_bounds = array<i64: 1>, scalar_prefetch = 0 : i64, scratch_operands = 0 : i64, tpu.core_type = #tpu.core_type<tc>, window_params = [{transform_indices = @transform_0, window_bounds = array<i64: 2, 8, 32>}, {transform_indices = @transform_1, window_bounds = array<i64: 2, 32>}, {pipeline_mode = #tpu.pipeline_mode<synchronous>, transform_indices = @transform_2, window_bounds = array<i64: 1, 32>}, {pipeline_mode = #tpu.pipeline_mode<synchronous>, transform_indices = @transform_3, window_bounds = array<i64: 1, 32>}, {pipeline_mode = #tpu.pipeline_mode<synchronous>, transform_indices = @transform_4, window_bounds = array<i64: 1, 1>}, {transform_indices = @transform_5, window_bounds = array<i64: 1, 2>}, {transform_indices = @transform_6, window_bounds = array<i64: 2, 8>}]} {
    %c0 = arith.constant 0 : index
    %c0_0 = arith.constant 0 : index
    %c0_1 = arith.constant 0 : index
    %0 = vector.load %arg1[%c0, %c0_0, %c0_1] : memref<2x8x32xf32, #tpu.memory_space<vmem>>, vector<2x8x32xf32>
    %c0_2 = arith.constant 0 : index
    %c0_3 = arith.constant 0 : index
    %1 = vector.load %arg2[%c0_2, %c0_3] : memref<2x32xf32, #tpu.memory_space<vmem>>, vector<2x32xf32>
    %c0_4 = arith.constant 0 : index
    %c0_5 = arith.constant 0 : index
    %2 = vector.load %arg3[%c0_4, %c0_5] : memref<1x32xf32, #tpu.memory_space<vmem>>, vector<1x32xf32>
    %c0_6 = arith.constant 0 : index
    %c0_7 = arith.constant 0 : index
    %3 = vector.load %arg4[%c0_6, %c0_7] : memref<1x32xf32, #tpu.memory_space<vmem>>, vector<1x32xf32>
    %c0_8 = arith.constant 0 : index
    %c0_9 = arith.constant 0 : index
    %4 = vector.load %arg5[%c0_8, %c0_9] : memref<1x1xf32, #tpu.memory_space<vmem>>, vector<1x1xf32>
    %5 = vector.shape_cast %2 : vector<1x32xf32> to vector<1x1x32xf32>
    %6 = vector.broadcast %5 : vector<1x1x32xf32> to vector<2x8x32xf32>
    %7 = arith.mulf %0, %6 : vector<2x8x32xf32>
    %cst = arith.constant dense<0.000000e+00> : vector<2x8xf32>
    %8 = vector.multi_reduction <add>, %7, %cst [2] : vector<2x8x32xf32> to vector<2x8xf32>
    %9 = vector.broadcast %3 : vector<1x32xf32> to vector<2x32xf32>
    %10 = arith.mulf %1, %9 : vector<2x32xf32>
    %cst_10 = arith.constant dense<0.000000e+00> : vector<2xf32>
    %11 = vector.multi_reduction <add>, %10, %cst_10 [1] : vector<2x32xf32> to vector<2xf32>
    %12 = vector.shape_cast %11 : vector<2xf32> to vector<2x1xf32>
    %13 = vector.broadcast %12 : vector<2x1xf32> to vector<2x8xf32>
    %14 = arith.addf %8, %13 : vector<2x8xf32>
    %15 = vector.broadcast %4 : vector<1x1xf32> to vector<2x8xf32>
    %16 = arith.addf %14, %15 : vector<2x8xf32>
    %cst_11 = arith.constant dense<0xFF800000> : vector<2xf32>
    %17 = vector.multi_reduction <maximumf>, %16, %cst_11 [1] : vector<2x8xf32> to vector<2xf32>
    %18 = vector.shape_cast %17 : vector<2xf32> to vector<2x1xf32>
    %19 = vector.broadcast %18 : vector<2x1xf32> to vector<2x8xf32>
    %20 = arith.subf %16, %19 : vector<2x8xf32>
    %21 = math.exp %20 : vector<2x8xf32>
    %cst_12 = arith.constant dense<0.000000e+00> : vector<2xf32>
    %22 = vector.multi_reduction <add>, %21, %cst_12 [1] : vector<2x8xf32> to vector<2xf32>
    %23 = vector.shape_cast %22 : vector<2xf32> to vector<2x1xf32>
    %24 = vector.broadcast %23 : vector<2x1xf32> to vector<2x8xf32>
    %25 = arith.divf %21, %24 : vector<2x8xf32>
    %26 = arith.mulf %0, %0 : vector<2x8x32xf32>
    %cst_13 = arith.constant dense<0.000000e+00> : vector<2x8xf32>
    %27 = vector.multi_reduction <add>, %26, %cst_13 [2] : vector<2x8x32xf32> to vector<2x8xf32>
    %28 = vector.shape_cast %1 : vector<2x32xf32> to vector<2x1x32xf32>
    %29 = vector.broadcast %28 : vector<2x1x32xf32> to vector<2x8x32xf32>
    %30 = arith.mulf %0, %29 : vector<2x8x32xf32>
    %cst_14 = arith.constant dense<0.000000e+00> : vector<2x8xf32>
    %31 = vector.multi_reduction <add>, %30, %cst_14 [2] : vector<2x8x32xf32> to vector<2x8xf32>
    %32 = arith.mulf %1, %1 : vector<2x32xf32>
    %cst_15 = arith.constant dense<0.000000e+00> : vector<2xf32>
    %33 = vector.multi_reduction <add>, %32, %cst_15 [1] : vector<2x32xf32> to vector<2xf32>
    %34 = vector.shape_cast %33 : vector<2xf32> to vector<2x1xf32>
    %cst_16 = arith.constant 2.000000e+00 : f32
    %35 = vector.broadcast %cst_16 : f32 to vector<2x8xf32>
    %36 = arith.mulf %35, %31 : vector<2x8xf32>
    %37 = arith.subf %27, %36 : vector<2x8xf32>
    %38 = vector.broadcast %34 : vector<2x1xf32> to vector<2x8xf32>
    %39 = arith.addf %37, %38 : vector<2x8xf32>
    %cst_17 = arith.constant 0.000000e+00 : f32
    %40 = vector.broadcast %cst_17 : f32 to vector<2x8xf32>
    %41 = arith.maximumf %39, %40 : vector<2x8xf32>
    %42 = math.sqrt %41 : vector<2x8xf32>
    %43 = arith.mulf %42, %25 : vector<2x8xf32>
    %cst_18 = arith.constant dense<0.000000e+00> : vector<2xf32>
    %44 = vector.multi_reduction <add>, %43, %cst_18 [1] : vector<2x8xf32> to vector<2xf32>
    %c0_19 = arith.constant 0 : index
    %c0_20 = arith.constant 0 : index
    %45 = vector.load %arg7[%c0_19, %c0_20] : memref<2x8xf32, #tpu.memory_space<vmem>>, vector<2x8xf32>
    tpu.vector_store %arg7[%c0_19, %c0_20], %25 {strides = array<i32>} : memref<2x8xf32, #tpu.memory_space<vmem>>, vector<2x8xf32>,
    %46 = vector.shape_cast %44 : vector<2xf32> to vector<1x2xf32>
    %c0_21 = arith.constant 0 : index
    %c0_22 = arith.constant 0 : index
    %47 = vector.load %arg6[%c0_21, %c0_22] : memref<1x2xf32, #tpu.memory_space<vmem>>, vector<1x2xf32>
    tpu.vector_store %arg6[%c0_21, %c0_22], %46 {strides = array<i32>} : memref<1x2xf32, #tpu.memory_space<vmem>>, vector<1x2xf32>,
    return
  }
  func.func @transform_0(%arg0: i32) -> (i32, i32, i32) {
    %c0_i32 = arith.constant 0 : i32
    %c0_i32_0 = arith.constant 0 : i32
    %c0_i32_1 = arith.constant 0 : i32
    return %arg0, %c0_i32, %c0_i32_0 : i32, i32, i32
  }
  func.func @transform_1(%arg0: i32) -> (i32, i32) {
    %c0_i32 = arith.constant 0 : i32
    %c0_i32_0 = arith.constant 0 : i32
    return %arg0, %c0_i32 : i32, i32
  }
  func.func @transform_2(%arg0: i32) -> (i32, i32) {
    %c0_i32 = arith.constant 0 : i32
    %c0_i32_0 = arith.constant 0 : i32
    %c0_i32_1 = arith.constant 0 : i32
    return %c0_i32, %c0_i32_0 : i32, i32
  }
  func.func @transform_3(%arg0: i32) -> (i32, i32) {
    %c0_i32 = arith.constant 0 : i32
    %c0_i32_0 = arith.constant 0 : i32
    %c0_i32_1 = arith.constant 0 : i32
    return %c0_i32, %c0_i32_0 : i32, i32
  }
  func.func @transform_4(%arg0: i32) -> (i32, i32) {
    %c0_i32 = arith.constant 0 : i32
    %c0_i32_0 = arith.constant 0 : i32
    %c0_i32_1 = arith.constant 0 : i32
    return %c0_i32, %c0_i32_0 : i32, i32
  }
  func.func @transform_5(%arg0: i32) -> (i32, i32) {
    %c0_i32 = arith.constant 0 : i32
    %c0_i32_0 = arith.constant 0 : i32
    return %c0_i32, %arg0 : i32, i32
  }
  func.func @transform_6(%arg0: i32) -> (i32, i32) {
    %c0_i32 = arith.constant 0 : i32
    %c0_i32_0 = arith.constant 0 : i32
    return %arg0, %c0_i32 : i32, i32
  }
}

</mosaic_0001>

<bundles_post_ra>
// kernel: tpu_custom_call.1
= control target key start
LH: loop header
LB: loop body
LE: loop exit
PB: predicated region body
PF: predicated region fallthrough
CT: control target
= control target key end

     0   :  { %s572_s0 = inlined_call_operand.hbm [shape: f32[2,8,32], index: 0, kind: input, shape index: {}]   ;;  %s573_s1 = inlined_call_operand.vmem [shape: f32[2,32], index: 1, kind: input, shape index: {}]   ;;  %s574_s2 = inlined_call_operand.vmem [shape: f32[1,32], index: 2, kind: input, shape index: {}]   ;;  %s575_s3 = inlined_call_operand.vmem [shape: f32[1,32], index: 3, kind: input, shape index: {}]   ;;  %s576_s4 = inlined_call_operand.<no memory space> [shape: f32[1,1], index: 4, kind: input, shape index: {}]   ;;  %s577_s5 = inlined_call_operand.hbm [shape: f32[1,2], index: 5, kind: output, shape index: {0}]   ;;  %s578_s6 = inlined_call_operand.hbm [shape: f32[2,8], index: 6, kind: output, shape index: {1}]  }
   0x1   :  { %v12_v0 = vstv %s576_s4 }
   0x2   :  { %13 = vst [vmem:[#allocation2] sm:$0x1] %v12_v0 }
   0x3   :  { %14 = vsyncpa [#allocation4], 0 }
   0x4   :  { %15 = vsyncpa [#allocation5], 0 }
   0x5   :  { %16 = vsyncpa [#allocation8], 0  ;;  %s435_s23 = smov [#allocation3]   ;;  %s363_s27 = scalar_lea.hbm %s572_s0, 256 }
   0x6   :  { %s22_s24 = sshll.u32 %s435_s23, 4  ;;  %p364_p0 = scmp.ne.s32.totalorder %s572_s0, %s363_s27  ;;  %s23_s24 = int_to_ptr.vmem [resolvable:$true] %s22_s24 }
   0x7   :  { %p367_p1 = scmp.lt.u32.totalorder %s363_s27, %s572_s0 }
   0x9   :  { %p369_p2 = pnand %p367_p1, %p364_p0 }
   0xb   :  { %372 = shalt.err (!%p369_p2)
}
   0xc   :  { %s373_s4 = scalar_lea.vmem %s23_s24, 256  ;;  %p378_p4 = scmp.lt.s32.totalorder %s23_s24, %s23_s24 }
   0xd   :  { %p374_p3 = scmp.ne.s32.totalorder %s23_s24, %s373_s4  ;;  %p379_p5 = scmp.lt.s32.totalorder %s373_s4, %s373_s4 }
   0xf   :  { %p380_p6 = por %p379_p5, %p378_p4 }
  0x11   :  { %p381_p7 = pnand %p380_p6, %p374_p3 }
  0x13   :  { %384 = shalt.err (!%p381_p7)
}
  0x14   :  { %s436_s8 = smov 128   ;;  %s437_s9 = smov 8  }
  0x15   :  { %28 = dma.hbm_to_vmem [thread:$0]  %s572_s0, 256, %s23_s24, [#allocation4], %s436_s8, %s436_s8, %s437_s9  }
  0x16   :  { %429 = dma.done.wait [#allocation4], 256  }
  0x17   :  { %430 = vsyncadd [#allocation4], 4294967040  ;;  %v73_v1 = vlaneseq  ;;  %v438_v4 = vmov 0   ;;  %v42_v6 = vld [vmem:[%s573_s1] sm:$0x3]  ;;  %vm68_vm0 = vcmask 254976  }
  0x18   :  { %349 = vset.pattern.permute.xlu1 %v438_v4  ;;  %350 = vset.pattern.permute.xlu0 %v438_v4  ;;  %v340_v7 = vld [vmem:[%s575_s3] ss:$0 sm:$0xff]  ;;  %v41_v8 = vld [vmem:[#allocation3 + $0x8] sm:$0xff]  ;;  %vm54_vm1 = vcmask 261120   ;;  %v503_v11 = vld [vmem:[#allocation3] sm:$0xff]  ;;  %vm114_vm2 = vcmask 1041409   ;;  %v223_v50 = vmul.f32 %v42_v6, %v42_v6 }
  0x19   :  { %v74_v2 = vshrl.u32 %v73_v1, 7  ;;  %v105_v3 = vand.u32 127, %v73_v1  ;;  %v67_v9 = vmul.f32 %v340_v7, %v42_v6  ;;  %v339_v10 = vld [vmem:[%s574_s2] ss:$0 sm:$0xff]  ;;  %vm117_vm3 = vcmask 58368   ;;  %s440_s1 = smov [#allocation7]  }
  0x1a   :  { %v53_v12 = vmul.f32 %v339_v10, %v41_v8  ;;  %v52_v13 = vmul.f32 %v339_v10, %v503_v11  ;;  %v341_v17 = vld [vmem:[#allocation2] ss:$0 sm:$0xff]  ;;  %v439_v36 = vmov 1966171168   ;;  %v174_v45 = vmul.f32 %v503_v11, %v503_v11  ;;  %s326_s2 = sshll.u32 %s440_s1, 4  ;;  %s327_s2 = int_to_ptr.vmem [resolvable:$true] %s326_s2 }
  0x1b   :  { %v492_v5 = vsub.s32 %v105_v3, %v74_v2  ;;  %v69_v14 = vsel %vm68_vm0, %v67_v9, 0.0  ;;  %v509_v18 = vsub.s32 1, %v74_v2  ;;  %v511_v19 = vsub.s32 0, %v74_v2  ;;  %s385_s3 = scalar_lea.vmem %s327_s2, 32  ;;  %p390_p9 = scmp.lt.s32.totalorder %s327_s2, %s327_s2 }
  0x1c   :  { %70 = vadd.xlane.f32.xlu0 %v69_v14  ;;  %v58_v15 = vsel %vm54_vm1, %v53_v12, 0.0  ;;  %v55_v16 = vsel %vm54_vm1, %v52_v13, 0.0  ;;  %v184_v37 = vunpack.c.l.s4 %v439_v36  ;;  %v176_v47 = vsel %vm54_vm1, %v174_v45, 0.0  ;;  %p386_p8 = scmp.ne.s32.totalorder %s327_s2, %s385_s3  ;;  %p391_p10 = scmp.lt.s32.totalorder %s385_s3, %s385_s3 }
  0x1d   :  { %59 = vadd.xlane.f32.xlu1 %v58_v15  ;;  %v175_v48 = vmul.f32 %v41_v8, %v41_v8  ;;  %v224_v51 = vsel %vm68_vm0, %v223_v50, 0.0 }
  0x1e   :  { %v185_v38 = vunpack.c.0.s8 %v184_v37  ;;  %p392_p11 = por %p391_p10, %p390_p9 }
  0x1f   :  { %v179_v49 = vsel %vm54_vm1, %v175_v48, 0.0 }
  0x20   :  { %56 = vadd.xlane.f32.xlu0 %v55_v16  ;;  %v188_v39 = vsub.s32 %v185_v38, %v74_v2  ;;  %p393_p12 = pnand %p392_p11, %p386_p8 }
  0x22   :  { %v189_v40 = vrot.slane %v42_v6, %v188_v39 }
  0x24   :  { %v190_v41 = vcombine.high %v189_v40, %v189_v40  ;;  %v197_v61 = vrot.slane %v189_v40, %v188_v39 }
  0x26   :  { %v204_v42 = vrot.slane %v190_v41, %v188_v39  ;;  %v208_v62 = vrot.slane %v197_v61, %v511_v19 }
  0x28   :  { %v212_v43 = vrot.slane %v204_v42, %v511_v19  ;;  %v215_v63 = vmul.f32 %v208_v62, %v503_v11 }
  0x2a   :  { %v216_v44 = vmul.f32 %v212_v43, %v41_v8  ;;  %v217_v0 = vsel %vm54_vm1, %v215_v63, 0.0 }
  0x2c   :  { %v220_v46 = vsel %vm54_vm1, %v216_v44, 0.0 }
  0x2e   :  { %91 = vperm.xlu1 %349, %v341_v17  }
  0xa9   :  { %v71_v20 = vpop.xlane.xlu0 %70 }
  0xaa   :  { %v80_v21 = vrot.slane %v71_v20, %v509_v18  ;;  %v60_v22 = vpop.xlane.xlu1 %59  ;;  %v76_v23 = vrot.slane %v71_v20, %v511_v19 }
  0xac   :  { %v84_v24 = vadd.f32 %v80_v21, %v60_v22 }
  0xad   :  { %v57_v25 = vpop.xlane.xlu0 %56 }
  0xae   :  { %v92_v26 = vpop.permute.xlu1 %91  ;;  %v83_v27 = vadd.f32 %v76_v23, %v57_v25 }
  0xaf   :  { %v95_v28 = vadd.f32 %v92_v26, %v84_v24 }
  0xb0   :  { %v94_v29 = vadd.f32 %v92_v26, %v83_v27 }
  0xb1   :  { %102 = vperm.xlu1 %349, %v95_v28  }
  0xb2   :  { %99 = vperm.xlu0 %350, %v94_v29  }
 0x130   :  { %v103_v30 = vpop.permute.xlu1 %102 }
 0x131   :  { %v100_v31 = vpop.permute.xlu0 %99  ;;  %v113_v32 = vrot.slane %v103_v30, %v492_v5 }
 0x132   :  { %v109_v33 = vrot.slane %v100_v31, %v492_v5 }
 0x134   :  { %v115_v34 = vsel %vm114_vm2, %v113_v32, %v109_v33 }
 0x135   :  { %v118_v35 = vsel %vm117_vm3, %v115_v34, -inf }
 0x136   :  { %119 = vmax.xlane.f32.xlu1 %v118_v35 }
 0x13a   :  { %221 = vadd.xlane.f32.xlu1 %v220_v46 }
 0x13e   :  { %177 = vadd.xlane.f32.xlu1 %v176_v47 }
 0x142   :  { %180 = vadd.xlane.f32.xlu1 %v179_v49 }
 0x146   :  { %225 = vadd.xlane.f32.xlu1 %v224_v51 }
 0x1c3   :  { %v120_v52 = vpop.xlane.xlu1 %119 }
 0x1c4   :  { %v125_v53 = vrot.slane %v120_v52, %v511_v19  ;;  %v129_v54 = vrot.slane %v120_v52, %v509_v18 }
 0x1c6   :  { %v132_v55 = vsub.f32 %v94_v29, %v125_v53  ;;  %v133_v56 = vsub.f32 %v95_v28, %v129_v54 }
 0x1c7   :  { %v222_v8 = vpop.xlane.xlu1 %221 }
 0x1c8   :  { %v134_v57 = vmul.f32 1.442695, %v132_v55  ;;  %v136_v58 = vmul.f32 1.442695, %v133_v56  ;;  %v228_v11 = vmul.f32 2.0, %v222_v8 }
 0x1ca   :  { %351 = vpow2.f32 %v134_v57 }
 0x1cb   :  { %353 = vpow2.f32 %v136_v58  ;;  %v178_v9 = vpop.xlane.xlu1 %177 }
 0x1cf   :  { %v181_v10 = vpop.xlane.xlu1 %180 }
 0x1d0   :  { %v230_v17 = vsub.f32 %v181_v10, %v228_v11 }
 0x1d3   :  { %v226_v14 = vpop.xlane.xlu1 %225 }
 0x1d4   :  { %v352_v59 = vpop.eup %351  ;;  %v235_v16 = vrot.slane %v226_v14, %v511_v19  ;;  %v239_v20 = vrot.slane %v226_v14, %v509_v18 }
 0x1d5   :  { %141 = vperm.xlu0 %350, %v352_v59   ;;  %v354_v60 = vpop.eup %353 }
 0x1d6   :  { %v243_v22 = vadd.f32 %v239_v20, %v230_v17 }
 0x1d8   :  { %v245_v24 = vmax.f32 %v243_v22, 0.0 }
 0x1d9   :  { %144 = vperm.xlu0 %350, %v354_v60  }
 0x1da   :  { %vm255_vm5 = vcmp.eq.f32.partialorder %v245_v24, inf  ;;  %v258_v33 = vand.u32 2147483648, %v245_v24  ;;  %vm257_vm7 = vcmp.eq.f32.partialorder %v245_v24, 0.0 }
 0x1f8   :  { %218 = vadd.xlane.f32.xlu0 %v217_v0 }
 0x254   :  { %v142_v1 = vpop.permute.xlu0 %141 }
 0x255   :  { %v149_v3 = vrot.slane %v142_v1, %v492_v5 }
 0x258   :  { %v145_v2 = vpop.permute.xlu0 %144 }
 0x259   :  { %v153_v4 = vrot.slane %v145_v2, %v492_v5 }
 0x25b   :  { %v154_v6 = vsel %vm114_vm2, %v153_v4, %v149_v3 }
 0x25c   :  { %v156_v7 = vsel %vm117_vm3, %v154_v6, 0.0 }
 0x25d   :  { %157 = vadd.xlane.f32.xlu1 %v156_v7 }
 0x285   :  { %v219_v12 = vpop.xlane.xlu0 %218 }
 0x286   :  { %v227_v13 = vmul.f32 2.0, %v219_v12 }
 0x288   :  { %v229_v15 = vsub.f32 %v178_v9, %v227_v13 }
 0x28a   :  { %v242_v21 = vadd.f32 %v235_v16, %v229_v15 }
 0x28c   :  { %v244_v23 = vmax.f32 %v242_v21, 0.0 }
 0x28e   :  { %355 = vrsqrt.f32 %v244_v23  ;;  %vm248_vm4 = vcmp.eq.f32.partialorder %v244_v23, inf  ;;  %v251_v32 = vand.u32 2147483648, %v244_v23  ;;  %vm250_vm6 = vcmp.eq.f32.partialorder %v244_v23, 0.0 }
 0x28f   :  { %357 = vrsqrt.f32 %v245_v24 }
 0x298   :  { %v356_v28 = vpop.eup %355 }
 0x299   :  { %v358_v29 = vpop.eup %357  ;;  %v247_v30 = vmul.f32 %v356_v28, %v244_v23 }
 0x29a   :  { %v254_v31 = vmul.f32 %v358_v29, %v245_v24 }
 0x29b   :  { %v249_v34 = vsel %vm248_vm4, %v244_v23, %v247_v30 }
 0x29c   :  { %v256_v36 = vsel %vm255_vm5, %v245_v24, %v254_v31  ;;  %v252_v39 = vsel %vm250_vm6, %v251_v32, %v249_v34 }
 0x2ea   :  { %v158_v25 = vpop.xlane.xlu1 %157 }
 0x2eb   :  { %v163_v26 = vrot.slane %v158_v25, %v511_v19  ;;  %v167_v27 = vrot.slane %v158_v25, %v509_v18  ;;  %v259_v18 = vsel %vm257_vm7, %v258_v33, %v256_v36 }
 0x2ed   :  { %359 = vrcp.f32 %v163_v26 }
 0x2ee   :  { %361 = vrcp.f32 %v167_v27 }
 0x2f7   :  { %v360_v35 = vpop.eup %359 }
 0x2f8   :  { %v362_v37 = vpop.eup %361  ;;  %v171_v38 = vmul.f32 %v360_v35, %v352_v59 }
 0x2f9   :  { %v173_v19 = vmul.f32 %v362_v37, %v354_v60 }
 0x2fa   :  { %v260_v40 = vmul.f32 %v252_v39, %v171_v38 }
 0x2fb   :  { %v261_v41 = vmul.f32 %v259_v18, %v173_v19 }
 0x2fc   :  { %265 = vperm.xlu1 %349, %v260_v40  }
 0x2fd   :  { %268 = vperm.xlu0 %350, %v261_v41  }
 0x301   :  { %286 = vperm.xlu0 %350, %v171_v38  }
 0x305   :  { %289 = vperm.xlu0 %350, %v173_v19  }
 0x37b   :  { %v266_v42 = vpop.permute.xlu1 %265 }
 0x37c   :  { %v269_v43 = vpop.permute.xlu0 %268  ;;  %v273_v44 = vrot.slane %v266_v42, %v492_v5 }
 0x37d   :  { %v277_v45 = vrot.slane %v269_v43, %v492_v5 }
 0x37f   :  { %v278_v46 = vsel %vm114_vm2, %v277_v45, %v273_v44 }
 0x380   :  { %v287_v47 = vpop.permute.xlu0 %286  ;;  %v280_v48 = vsel %vm117_vm3, %v278_v46, 0.0 }
 0x381   :  { %281 = vadd.xlane.f32.xlu1 %v280_v48  ;;  %v294_v50 = vrot.slane %v287_v47, %v492_v5 }
 0x384   :  { %v290_v49 = vpop.permute.xlu0 %289 }
 0x385   :  { %v298_v51 = vrot.slane %v290_v49, %v492_v5 }
 0x387   :  { %v299_v52 = vsel %vm114_vm2, %v298_v51, %v294_v50 }
 0x388   :  { %301 = vst.msk [vmem:[#allocation7] sm:$0x3] %vm117_vm3, %v299_v52 }
 0x389   :  { %396 = shalt.err (!%p393_p12)
}
 0x38a   :  { %s397_s19 = scalar_lea.hbm %s578_s6, 32 }
 0x38b   :  { %p398_p13 = scmp.ne.s32.totalorder %s578_s6, %s397_s19  ;;  %p401_p0 = scmp.lt.u32.totalorder %s397_s19, %s578_s6 }
 0x38d   :  { %p403_p1 = pnand %p401_p0, %p398_p13 }
 0x38f   :  { %406 = shalt.err (!%p403_p1)
}
 0x390   :  { %329 = dma.vmem_to_hbm [thread:$0]  %s327_s2, 32, %s578_s6, [#allocation8]   ;;  %vm308_vm8 = vcmask 8192  }
 0x391   :  { %s441_s26 = smov [#allocation6]  }
 0x392   :  { %s316_s27 = sshll.u32 %s441_s26, 4  ;;  %s317_s27 = int_to_ptr.vmem [resolvable:$true] %s316_s27 }
 0x393   :  { %s407_s28 = scalar_lea.vmem %s317_s27, 16  ;;  %s411_s29 = scalar_lea.vmem %s317_s27, 32 }
 0x394   :  { %p408_p2 = scmp.ne.s32.totalorder %s317_s27, %s407_s28  ;;  %p412_p3 = scmp.lt.s32.totalorder %s317_s27, %s317_s27 }
 0x395   :  { %p413_p4 = scmp.lt.s32.totalorder %s411_s29, %s407_s28 }
 0x397   :  { %p414_p5 = por %p413_p4, %p412_p3 }
 0x399   :  { %p415_p6 = pnand %p414_p5, %p408_p2 }
 0x40e   :  { %v282_v53 = vpop.xlane.xlu1 %281 }
 0x40f   :  { %v306_v54 = vrot.slane %v282_v53, %v492_v5 }
 0x411   :  { %309 = vst.msk [vmem:[#allocation6] sm:$0x1] %vm308_vm8, %v306_v54 }
 0x412   :  { %418 = shalt.err (!%p415_p6)
}
 0x413   :  { %s419_s6 = scalar_lea.hbm %s577_s5, 16 }
 0x414   :  { %p420_p7 = scmp.ne.s32.totalorder %s577_s5, %s419_s6  ;;  %p423_p8 = scmp.lt.u32.totalorder %s419_s6, %s577_s5 }
 0x416   :  { %p425_p9 = pnand %p423_p8, %p420_p7 }
 0x418   :  { %428 = shalt.err (!%p425_p9)
}
 0x419   :  { %319 = dma.vmem_to_hbm [thread:$0]  %s317_s27, 16, %s577_s5, [#allocation5]  }
 0x41a   :  { %431 = dma.done.wait [#allocation5], 16  }
 0x41b   :  { %432 = vsyncadd [#allocation5], 4294967280 }
 0x41c   :  { %433 = dma.done.wait [#allocation8], 32  }
 0x41d   :  { %434 = vsyncadd [#allocation8], 4294967264 }
 0x41e   :  { %336 = vsyncpa [#allocation4], 1 }
 0x41f   :  { %337 = vsyncpa [#allocation5], 1 }
 0x420   :  { %338 = vsyncpa [#allocation8], 1 }

</bundles_post_ra>
